<compile_context>
chip_gen: v7x
topology: tpu7x:2x2x1
jax: 0.10.0
libtpu: 0.0.40
codegen_flags: <defaults>
</compile_context>

<pallas_src>
import jax
import jax.numpy as jnp
import numpy as np
from jax.experimental import pallas as pl
from jax.experimental.pallas import tpu as pltpu

# ---------------- static config (small, TPU-tile friendly) ----------------
BS = 2              # batch (bags)
NBT = 8             # nb_tiles per bag
FEAT = 128          # feature_depth (Conv1d in_channels)
N_CLUSTERS = 128    # default n_clusters
HIDDEN_FCN = 64     # default hidden_fcn
LANES = 128         # every weight / activation padded to 128 lanes
ROWS_PAD = 8        # sublane-dense output rows (full vreg store)

# -------- packed weight slab row layout (all segments 8-row aligned) ------
WCT_LO, WCT_HI = 0, FEAT                               # conv weight^T     (128,128)
W1T_LO, W1T_HI = WCT_HI, WCT_HI + N_CLUSTERS           # fc1 weight^T pad  (128,128)
W2T_LO, W2T_HI = W1T_HI, W1T_HI + LANES                # fc2 weight^T pad  (128,128)
BIAS_LO, BIAS_HI = W2T_HI, W2T_HI + 8                  # biases block      (8,128)
SLAB_ROWS = BIAS_HI                                    # 392 rows (multiple of 8)


# ---------------------------- Pallas kernel -------------------------------
def model1s_kernel(x_ref, slab_ref, out_ref):
    # x: whole batch flattened to (BS*NBT, FEAT) -> one well-shaped MXU matmul.
    x = x_ref[...]

    # Static, 8-row-aligned views into the packed weight slab (no extra DMAs).
    wct = slab_ref[WCT_LO:WCT_HI, :]          # (FEAT, N_CLUSTERS)
    w1t = slab_ref[W1T_LO:W1T_HI, :]          # (N_CLUSTERS, 128)  lane-padded
    w2t = slab_ref[W2T_LO:W2T_HI, :]          # (128, 128)         lane-padded
    biases = slab_ref[BIAS_LO:BIAS_HI, :]     # (8, 128) full-tile load
    bc = biases[0:1, :]                       # conv bias
    b1 = biases[1:2, :]                       # fc1 bias (lane-padded with zeros)
    b2 = biases[2:3, :]                       # fc2 bias (lane-padded with zeros)

    # continuous_clusters: Conv1d(k=1) == per-tile Linear; weight pre-transposed.
    h = jnp.dot(x, wct, preferred_element_type=jnp.float32) + bc
    h = jnp.maximum(h, 0.0)                   # ReLU
    # TODO(synk): BatchNorm1d skipped (use_bn False at batch_size<=8 -> Identity);
    #             Dropout skipped (eval/inference mode -> identity).

    # max over the tile axis, per bag: (BS*NBT, C) -> (BS, NBT, C) -> (BS, C),
    # then pad to a full 8-sublane block so every downstream op is vreg-dense.
    pooled = jnp.max(h.reshape(BS, NBT, N_CLUSTERS), axis=1)              # (BS, C)
    pooled = jnp.concatenate(
        [pooled, jnp.zeros((ROWS_PAD - BS, N_CLUSTERS), jnp.float32)], axis=0)

    # classifier: Linear -> ReLU -> Linear(->1, lane-padded) -> Sigmoid
    z = jnp.maximum(jnp.dot(pooled, w1t, preferred_element_type=jnp.float32) + b1, 0.0)
    logits = jnp.dot(z, w2t, preferred_element_type=jnp.float32) + b2     # (8, 128)
    out_ref[...] = jax.nn.sigmoid(logits)     # full (8,128) unmasked store


# ------------------------------ wrapper ------------------------------------
def model1s_forward(x, slab):
    x2d = x.reshape(BS * NBT, FEAT)           # free host-side reshape

    vmem = lambda: pl.BlockSpec(memory_space=pltpu.MemorySpace.VMEM)
    cost = pl.CostEstimate(
        flops=(2 * BS * NBT * FEAT * N_CLUSTERS
               + 2 * ROWS_PAD * N_CLUSTERS * LANES
               + 2 * ROWS_PAD * LANES * LANES),
        transcendentals=ROWS_PAD * LANES,
        bytes_accessed=4 * (BS * NBT * FEAT + SLAB_ROWS * LANES + ROWS_PAD * LANES),
    )
    out = pl.pallas_call(
        model1s_kernel,
        out_shape=jax.ShapeDtypeStruct((ROWS_PAD, LANES), jnp.float32),
        in_specs=[vmem(), vmem()],
        out_specs=vmem(),
        cost_estimate=cost,
    )(x2d, slab)
    return out[:BS, 0]                        # (BS,)


# ---------------------- deterministic parameter init -----------------------
def init_params(key):
    """Torch-default initialised parameters in their PyTorch layouts."""
    ks = jax.random.split(key, 6)

    bnd_c = 1.0 / np.sqrt(FEAT)               # Conv1d(FEAT -> N_CLUSTERS, k=1)
    wc = jax.random.uniform(ks[0], (N_CLUSTERS, FEAT), jnp.float32, -bnd_c, bnd_c)
    bc = jax.random.uniform(ks[1], (N_CLUSTERS,), jnp.float32, -bnd_c, bnd_c)

    bnd1 = 1.0 / np.sqrt(N_CLUSTERS)           # Linear(N_CLUSTERS -> HIDDEN_FCN)
    w1 = jax.random.uniform(ks[2], (HIDDEN_FCN, N_CLUSTERS), jnp.float32, -bnd1, bnd1)
    b1 = jax.random.uniform(ks[3], (HIDDEN_FCN,), jnp.float32, -bnd1, bnd1)

    bnd2 = 1.0 / np.sqrt(HIDDEN_FCN)           # Linear(HIDDEN_FCN -> 1)
    w2 = jax.random.uniform(ks[4], (1, HIDDEN_FCN), jnp.float32, -bnd2, bnd2)
    b2 = jax.random.uniform(ks[5], (1,), jnp.float32, -bnd2, bnd2)
    return (wc, bc, w1, b1, w2, b2)


def pack_params(params):
    """Pack all weights/biases into one lane-padded (SLAB_ROWS, 128) f32 slab."""
    wc, bc, w1, b1, w2, b2 = params
    slab = jnp.zeros((SLAB_ROWS, LANES), jnp.float32)
    slab = slab.at[WCT_LO:WCT_HI, :N_CLUSTERS].set(wc.T)          # conv weight^T
    slab = slab.at[W1T_LO:W1T_HI, :HIDDEN_FCN].set(w1.T)          # fc1 weight^T
    slab = slab.at[W2T_LO:W2T_LO + HIDDEN_FCN, 0].set(w2[0])      # fc2 weight^T (col 0)
    slab = slab.at[BIAS_LO, :N_CLUSTERS].set(bc)                  # conv bias
    slab = slab.at[BIAS_LO + 1, :HIDDEN_FCN].set(b1)              # fc1 bias
    slab = slab.at[BIAS_LO + 2, 0].set(b2[0])                     # fc2 bias
    return slab


# --------------------------- pure-JAX reference -----------------------------
def reference(x, params):
    wc, bc, w1, b1, w2, b2 = params
    h = jnp.maximum(jnp.einsum('bnd,cd->bnc', x, wc) + bc, 0.0)   # (B, N, C)
    pooled = jnp.max(h, axis=1)                                   # (B, C)
    z = jnp.maximum(pooled @ w1.T + b1, 0.0)                      # (B, H)
    logit = z @ w2.T + b2                                         # (B, 1)
    return jax.nn.sigmoid(logit)[:, 0]                            # (B,)


if __name__ == "__main__":
    key = jax.random.PRNGKey(0)
    kx, kp = jax.random.split(key)
    x = jax.random.normal(kx, (BS, NBT, FEAT), jnp.float32)
    params = init_params(kp)
    slab = pack_params(params)

    out = jax.block_until_ready(model1s_forward(x, slab))
    ref = jax.block_until_ready(reference(x, params))
    np.testing.assert_allclose(np.asarray(out), np.asarray(ref),
                               rtol=1e-5, atol=1e-5)
    print("KERNEL_OK")
</pallas_src>

<mosaic_0001>
module attributes {stable_mosaic.version = 11 : i64} {
  func.func @model1s_kernel(%arg0: memref<16x128xf32, #tpu.memory_space<vmem>>, %arg1: memref<392x128xf32, #tpu.memory_space<vmem>>, %arg2: memref<8x128xf32, #tpu.memory_space<vmem>>) attributes {dimension_semantics = [], scalar_prefetch = 0 : i64, scratch_operands = 0 : i64, tpu.core_type = #tpu.core_type<tc>} {
    %c0 = arith.constant 0 : index
    %c0_0 = arith.constant 0 : index
    %0 = vector.load %arg0[%c0, %c0_0] : memref<16x128xf32, #tpu.memory_space<vmem>>, vector<16x128xf32>
    %c0_1 = arith.constant 0 : index
    %c0_2 = arith.constant 0 : index
    %1 = vector.load %arg1[%c0_1, %c0_2] : memref<392x128xf32, #tpu.memory_space<vmem>>, vector<128x128xf32>
    %c128 = arith.constant 128 : index
    %c0_3 = arith.constant 0 : index
    %2 = vector.load %arg1[%c128, %c0_3] : memref<392x128xf32, #tpu.memory_space<vmem>>, vector<128x128xf32>
    %c256 = arith.constant 256 : index
    %c0_4 = arith.constant 0 : index
    %3 = vector.load %arg1[%c256, %c0_4] : memref<392x128xf32, #tpu.memory_space<vmem>>, vector<128x128xf32>
    %c384 = arith.constant 384 : index
    %c0_5 = arith.constant 0 : index
    %4 = vector.load %arg1[%c384, %c0_5] : memref<392x128xf32, #tpu.memory_space<vmem>>, vector<8x128xf32>
    %5 = vector.extract_strided_slice %4 {offsets = [0, 0], sizes = [1, 128], strides = [1, 1]} : vector<8x128xf32> to vector<1x128xf32>
    %6 = vector.extract_strided_slice %4 {offsets = [1, 0], sizes = [1, 128], strides = [1, 1]} : vector<8x128xf32> to vector<1x128xf32>
    %7 = vector.extract_strided_slice %4 {offsets = [2, 0], sizes = [1, 128], strides = [1, 1]} : vector<8x128xf32> to vector<1x128xf32>
    %cst = arith.constant dense<0.000000e+00> : vector<16x128xf32>
    %8 = tpu.matmul %0, %1, %cst {dimension_numbers = #tpu.dot_dimension_numbers<[1], [0], [0], [1], [0, 0, 1, 1], [], []>} : vector<16x128xf32>, vector<128x128xf32>, vector<16x128xf32> -> vector<16x128xf32>
    %9 = vector.broadcast %5 : vector<1x128xf32> to vector<16x128xf32>
    %10 = arith.addf %8, %9 : vector<16x128xf32>
    %cst_6 = arith.constant 0.000000e+00 : f32
    %11 = vector.broadcast %cst_6 : f32 to vector<16x128xf32>
    %12 = arith.maximumf %10, %11 : vector<16x128xf32>
    %13 = vector.shape_cast %12 : vector<16x128xf32> to vector<2x8x128xf32>
    %cst_7 = arith.constant dense<0xFF800000> : vector<2x128xf32>
    %14 = vector.multi_reduction <maximumf>, %13, %cst_7 [1] : vector<2x8x128xf32> to vector<2x128xf32>
    %cst_8 = arith.constant 0.000000e+00 : f32
    %15 = vector.broadcast %cst_8 : f32 to vector<6x128xf32>
    %16 = tpu.concatenate %14, %15 in 0 : vector<2x128xf32>, vector<6x128xf32> -> vector<8x128xf32>
    %cst_9 = arith.constant dense<0.000000e+00> : vector<8x128xf32>
    %17 = tpu.matmul %16, %2, %cst_9 {dimension_numbers = #tpu.dot_dimension_numbers<[1], [0], [0], [1], [0, 0, 1, 1], [], []>} : vector<8x128xf32>, vector<128x128xf32>, vector<8x128xf32> -> vector<8x128xf32>
    %18 = vector.broadcast %6 : vector<1x128xf32> to vector<8x128xf32>
    %19 = arith.addf %17, %18 : vector<8x128xf32>
    %cst_10 = arith.constant 0.000000e+00 : f32
    %20 = vector.broadcast %cst_10 : f32 to vector<8x128xf32>
    %21 = arith.maximumf %19, %20 : vector<8x128xf32>
    %cst_11 = arith.constant dense<0.000000e+00> : vector<8x128xf32>
    %22 = tpu.matmul %21, %3, %cst_11 {dimension_numbers = #tpu.dot_dimension_numbers<[1], [0], [0], [1], [0, 0, 1, 1], [], []>} : vector<8x128xf32>, vector<128x128xf32>, vector<8x128xf32> -> vector<8x128xf32>
    %23 = vector.broadcast %7 : vector<1x128xf32> to vector<8x128xf32>
    %24 = arith.addf %22, %23 : vector<8x128xf32>
    %25 = arith.negf %24 : vector<8x128xf32>
    %26 = math.exp %25 : vector<8x128xf32>
    %cst_12 = arith.constant 1.000000e+00 : f32
    %27 = vector.broadcast %cst_12 : f32 to vector<8x128xf32>
    %28 = arith.addf %27, %26 : vector<8x128xf32>
    %29 = arith.divf %27, %28 : vector<8x128xf32>
    %c0_13 = arith.constant 0 : index
    %c0_14 = arith.constant 0 : index
    %30 = vector.load %arg2[%c0_13, %c0_14] : memref<8x128xf32, #tpu.memory_space<vmem>>, vector<8x128xf32>
    tpu.vector_store %arg2[%c0_13, %c0_14], %29 {strides = array<i32>} : memref<8x128xf32, #tpu.memory_space<vmem>>, vector<8x128xf32>,
    return
  }
}

</mosaic_0001>

<bundles_post_ra>
// kernel: tpu_custom_call.1
= control target key start
LH: loop header
LB: loop body
LE: loop exit
PB: predicated region body
PF: predicated region fallthrough
CT: control target
= control target key end

     0   :  { %7 = vsyncpa [#allocation3], 0  ;;  %s761_s0 = inlined_call_operand.hbm [shape: f32[16,128], index: 0, kind: input, shape index: {}]   ;;  %s762_s1 = inlined_call_operand.hbm [shape: f32[392,128], index: 1, kind: input, shape index: {}]   ;;  %s763_s2 = inlined_call_operand.hbm [shape: f32[8,128], index: 2, kind: output, shape index: {}]  }
   0x1   :  { %8 = vsyncpa [#allocation6], 0 }
   0x2   :  { %9 = vsyncpa [#allocation4], 0  ;;  %s686_s9 = smov [#allocation2]   ;;  %s614_s13 = scalar_lea.hbm %s761_s0, 256 }
   0x3   :  { %s15_s10 = sshll.u32 %s686_s9, 4  ;;  %p615_p0 = scmp.ne.s32.totalorder %s761_s0, %s614_s13  ;;  %s16_s10 = int_to_ptr.vmem [resolvable:$true] %s15_s10 }
   0x4   :  { %p618_p1 = scmp.lt.u32.totalorder %s614_s13, %s761_s0 }
   0x6   :  { %p620_p2 = pnand %p618_p1, %p615_p0 }
   0x8   :  { %623 = shalt.err (!%p620_p2)
}
   0x9   :  { %s624_s18 = scalar_lea.vmem %s16_s10, 256  ;;  %p629_p4 = scmp.lt.s32.totalorder %s16_s10, %s16_s10 }
   0xa   :  { %p625_p3 = scmp.ne.s32.totalorder %s16_s10, %s624_s18  ;;  %p630_p5 = scmp.lt.s32.totalorder %s624_s18, %s624_s18 }
   0xc   :  { %p631_p6 = por %p630_p5, %p629_p4 }
   0xe   :  { %p632_p7 = pnand %p631_p6, %p625_p3 }
  0x10   :  { %635 = shalt.err (!%p632_p7)
}
  0x11   :  { %s687_s19 = smov 128   ;;  %s688_s20 = smov 8  }
  0x12   :  { %21 = dma.hbm_to_vmem [thread:$0]  %s761_s0, 256, %s16_s10, [#allocation3], %s687_s19, %s687_s19, %s688_s20  }
  0x13   :  { %s689_s23 = smov [#allocation5]   ;;  %s636_s27 = scalar_lea.hbm %s762_s1, 6272 }
  0x14   :  { %s27_s24 = sshll.u32 %s689_s23, 4  ;;  %p637_p8 = scmp.ne.s32.totalorder %s762_s1, %s636_s27  ;;  %s28_s24 = int_to_ptr.vmem [resolvable:$true] %s27_s24 }
  0x15   :  { %p640_p9 = scmp.lt.u32.totalorder %s636_s27, %s762_s1 }
  0x17   :  { %p642_p10 = pnand %p640_p9, %p637_p8 }
  0x19   :  { %645 = shalt.err (!%p642_p10)
}
  0x1a   :  { %s646_s4 = scalar_lea.vmem %s28_s24, 6272  ;;  %p651_p12 = scmp.lt.s32.totalorder %s28_s24, %s28_s24 }
  0x1b   :  { %p647_p11 = scmp.ne.s32.totalorder %s28_s24, %s646_s4  ;;  %p652_p13 = scmp.lt.s32.totalorder %s646_s4, %s646_s4 }
  0x1d   :  { %p653_p0 = por %p652_p13, %p651_p12 }
  0x1f   :  { %p654_p1 = pnand %p653_p0, %p647_p11 }
  0x21   :  { %657 = shalt.err (!%p654_p1)
}
  0x22   :  { %33 = dma.hbm_to_vmem [thread:$0]  %s762_s1, 6272, %s28_s24, [#allocation6], %s687_s19, %s687_s19, %s688_s20  }
  0x23   :  { %680 = dma.done.wait [#allocation3], 256  }
  0x24   :  { %681 = vsyncadd [#allocation3], 4294967040 }
  0x25   :  { %682 = dma.done.wait [#allocation6], 6272  }
  0x26   :  { %683 = vsyncadd [#allocation6], 4294961024  ;;  %v690_v0 = vmov 0.0|0.0   ;;  %v42_v1 = vld [vmem:[#allocation5] sm:$0xff]  ;;  %v43_v2 = vld [vmem:[#allocation5 + $0x8] sm:$0xff]  ;;  %vm691_vm0 = vmmov 0  }
  0x27   :  { %554 = vmatprep.subr.bf16.mxu1 %v690_v0  ;;  %v44_v3 = vld [vmem:[#allocation5 + $0x10] sm:$0xff]  ;;  %v522_v4 = vpack.c.bf16 %v43_v2, %v42_v1  ;;  %v45_v5 = vld [vmem:[#allocation5 + $0x18] sm:$0xff]  ;;  %v46_v7 = vld [vmem:[#allocation5 + $0x20] sm:$0xff]  ;;  %v692_v51 = vmov 0.0   ;;  %vm186_vm1 = vcmask 1041409   ;;  %vm189_vm2 = vcmask 1041408  }
  0x28   :  { %v526_v6 = vpack.c.bf16 %v45_v5, %v44_v3  ;;  %v47_v8 = vld [vmem:[#allocation5 + $0x28] sm:$0xff]  ;;  %v48_v10 = vld [vmem:[#allocation5 + $0x30] sm:$0xff]  ;;  %v49_v11 = vld [vmem:[#allocation5 + $0x38] sm:$0xff]  ;;  %484 = vmatprep.mubr.msk.f32.mxu1 %vm691_vm0, %v692_v51  ;;  %s693_s1 = smov [#allocation7]  }
  0x29   :  { %523 = vmatprep.subr.bf16.mxu0 %v522_v4  ;;  %v530_v9 = vpack.c.bf16 %v47_v8, %v46_v7  ;;  %v40_v12 = vld [vmem:[#allocation2] sm:$0xff]  ;;  %v58_v13 = vld [vmem:[#allocation5 + $0x80] sm:$0xff]  ;;  %v59_v14 = vld [vmem:[#allocation5 + $0x88] sm:$0xff]  ;;  %v534_v18 = vpack.c.bf16 %v49_v11, %v48_v10  ;;  %v91_v10 = vlaneseq  ;;  %s353_s6 = sshll.u32 %s693_s1, 4  ;;  %s354_s6 = int_to_ptr.vmem [resolvable:$true] %s353_s6 }
  0x2a   :  { %525 = vmatpush3.bf16.msra.mxu0 %v522_v4  ;;  %449 = vmatprep.mubr.f32.mxu0 %v40_v12  ;;  %v60_v15 = vld [vmem:[#allocation5 + $0x90] sm:$0xff]  ;;  %v555_v16 = vpack.c.bf16 %v59_v14, %v58_v13  ;;  %v61_v17 = vld [vmem:[#allocation5 + $0x98] sm:$0xff]  ;;  %v50_v19 = vld [vmem:[#allocation5 + $0x40] sm:$0xff]  ;;  %s658_s7 = scalar_lea.vmem %s354_s6, 128  ;;  %p663_p3 = scmp.lt.s32.totalorder %s354_s6, %s354_s6 }
  0x2b   :  { %527 = vmatprep.subr.bf16.mxu0 %v526_v6  ;;  %v558_v20 = vpack.c.bf16 %v61_v17, %v60_v15  ;;  %v51_v21 = vld [vmem:[#allocation5 + $0x48] sm:$0xff]  ;;  %v62_v22 = vld [vmem:[#allocation5 + $0xa0] sm:$0xff]  ;;  %v52_v26 = vld [vmem:[#allocation5 + $0x50] sm:$0xff]  ;;  %v92_v11 = vshrl.u32 %v91_v10, 7  ;;  %p659_p2 = scmp.ne.s32.totalorder %s354_s6, %s658_s7  ;;  %p664_p4 = scmp.lt.s32.totalorder %s658_s7, %s658_s7 }
  0x2c   :  { %556 = vmatpush3.bf16.msra.mxu1 %v555_v16  ;;  %v63_v23 = vld [vmem:[#allocation5 + $0xa8] sm:$0xff]  ;;  %v538_v24 = vpack.c.bf16 %v51_v21, %v50_v19  ;;  %v53_v27 = vld [vmem:[#allocation5 + $0x58] sm:$0xff]  ;;  %v54_v29 = vld [vmem:[#allocation5 + $0x60] sm:$0xff] }
  0x2d   :  { %557 = vmatprep.subr.bf16.mxu1 %v690_v0  ;;  %v561_v25 = vpack.c.bf16 %v63_v23, %v62_v22  ;;  %v542_v28 = vpack.c.bf16 %v53_v27, %v52_v26  ;;  %v55_v30 = vld [vmem:[#allocation5 + $0x68] sm:$0xff]  ;;  %v56_v32 = vld [vmem:[#allocation5 + $0x70] sm:$0xff]  ;;  %v57_v33 = vld [vmem:[#allocation5 + $0x78] sm:$0xff]  ;;  %v93_v12 = vsub.s32 0, %v92_v11  ;;  %p665_p5 = por %p664_p4, %p663_p3 }
  0x2e   :  { %529 = vmatpush3.bf16.msra.mxu0 %v526_v6  ;;  %v546_v31 = vpack.c.bf16 %v55_v30, %v54_v29  ;;  %v550_v34 = vpack.c.bf16 %v57_v33, %v56_v32  ;;  %v41_v35 = vld [vmem:[#allocation2 + $0x8] sm:$0xff]  ;;  %v64_v36 = vld [vmem:[#allocation5 + $0xb0] sm:$0xff]  ;;  %v66_v39 = vld [vmem:[#allocation5 + $0xc0] sm:$0xff] }
  0x2f   :  { %531 = vmatprep.subr.bf16.mxu0 %v530_v9  ;;  %v65_v37 = vld [vmem:[#allocation5 + $0xb8] sm:$0xff]  ;;  %v67_v40 = vld [vmem:[#allocation5 + $0xc8] sm:$0xff]  ;;  %v68_v42 = vld [vmem:[#allocation5 + $0xd0] sm:$0xff]  ;;  %p666_p6 = pnand %p665_p5, %p659_p2 }
  0x30   :  { %559 = vmatpush3.bf16.msra.mxu1 %v558_v20  ;;  %v564_v38 = vpack.c.bf16 %v65_v37, %v64_v36  ;;  %v567_v41 = vpack.c.bf16 %v67_v40, %v66_v39  ;;  %v69_v43 = vld [vmem:[#allocation5 + $0xd8] sm:$0xff]  ;;  %v70_v45 = vld [vmem:[#allocation5 + $0xe0] sm:$0xff]  ;;  %v71_v46 = vld [vmem:[#allocation5 + $0xe8] sm:$0xff]  ;;  %v193_v36 = vsub.s32 1, %v92_v11 }
  0x31   :  { %560 = vmatprep.subr.bf16.mxu1 %v690_v0  ;;  %v570_v44 = vpack.c.bf16 %v69_v43, %v68_v42  ;;  %v573_v47 = vpack.c.bf16 %v71_v46, %v70_v45  ;;  %v72_v48 = vld [vmem:[#allocation5 + $0xf0] sm:$0xff]  ;;  %v73_v49 = vld [vmem:[#allocation5 + $0xf8] sm:$0xff]  ;;  %v74_v52 = vld [vmem:[#allocation5 + $0x100] sm:$0xff]  ;;  %v268_v42 = vsub.s32 2, %v92_v11 }
  0x32   :  { %533 = vmatpush3.bf16.msra.mxu0 %v530_v9  ;;  %v576_v50 = vpack.c.bf16 %v73_v49, %v72_v48  ;;  %v75_v53 = vld [vmem:[#allocation5 + $0x108] sm:$0xff]  ;;  %v76_v54 = vld [vmem:[#allocation5 + $0x110] sm:$0xff]  ;;  %v77_v56 = vld [vmem:[#allocation5 + $0x118] sm:$0xff] }
  0x33   :  { %535 = vmatprep.subr.bf16.mxu0 %v534_v18  ;;  %v579_v55 = vpack.c.bf16 %v75_v53, %v74_v52  ;;  %v582_v57 = vpack.c.bf16 %v77_v56, %v76_v54  ;;  %v78_v58 = vld [vmem:[#allocation5 + $0x120] sm:$0xff]  ;;  %v79_v59 = vld [vmem:[#allocation5 + $0x128] sm:$0xff]  ;;  %v80_v61 = vld [vmem:[#allocation5 + $0x130] sm:$0xff] }
  0x34   :  { %562 = vmatpush3.bf16.msra.mxu1 %v561_v25  ;;  %v585_v60 = vpack.c.bf16 %v79_v59, %v78_v58  ;;  %v81_v62 = vld [vmem:[#allocation5 + $0x138] sm:$0xff]  ;;  %v82_v1 = vld [vmem:[#allocation5 + $0x140] sm:$0xff]  ;;  %v83_v2 = vld [vmem:[#allocation5 + $0x148] sm:$0xff] }
  0x35   :  { %563 = vmatprep.subr.bf16.mxu1 %v690_v0  ;;  %v588_v63 = vpack.c.bf16 %v81_v62, %v80_v61  ;;  %v591_v3 = vpack.c.bf16 %v83_v2, %v82_v1  ;;  %v84_v4 = vld [vmem:[#allocation5 + $0x150] sm:$0xff]  ;;  %v85_v5 = vld [vmem:[#allocation5 + $0x158] sm:$0xff]  ;;  %v86_v7 = vld [vmem:[#allocation5 + $0x160] sm:$0xff] }
  0x36   :  { %537 = vmatpush3.bf16.msra.mxu0 %v534_v18  ;;  %v594_v6 = vpack.c.bf16 %v85_v5, %v84_v4  ;;  %v87_v8 = vld [vmem:[#allocation5 + $0x168] sm:$0xff]  ;;  %v90_v13 = vld [vmem:[#allocation5 + $0x180] sm:$0xff]  ;;  %v88_v33 = vld [vmem:[#allocation5 + $0x170] sm:$0xff] }
  0x37   :  { %539 = vmatprep.subr.bf16.mxu0 %v538_v24  ;;  %v597_v9 = vpack.c.bf16 %v87_v8, %v86_v7  ;;  %v94_v14 = vrot.slane %v90_v13, %v93_v12  ;;  %v194_v37 = vrot.slane %v90_v13, %v193_v36  ;;  %v269_v43 = vrot.slane %v90_v13, %v268_v42 }
  0x38   :  { %565 = vmatpush3.bf16.msra.mxu1 %v564_v38 }
  0x39   :  { %566 = vmatprep.subr.bf16.mxu1 %v690_v0 }
  0x3a   :  { %541 = vmatpush3.bf16.msra.mxu0 %v538_v24 }
  0x3b   :  { %543 = vmatprep.subr.bf16.mxu0 %v542_v28 }
  0x3c   :  { %568 = vmatpush3.bf16.msra.mxu1 %v567_v41 }
  0x3d   :  { %569 = vmatprep.subr.bf16.mxu1 %v690_v0 }
  0x3e   :  { %545 = vmatpush3.bf16.msra.mxu0 %v542_v28 }
  0x3f   :  { %547 = vmatprep.subr.bf16.mxu0 %v546_v31 }
  0x40   :  { %571 = vmatpush3.bf16.msra.mxu1 %v570_v44 }
  0x41   :  { %572 = vmatprep.subr.bf16.mxu1 %v690_v0 }
  0x42   :  { %549 = vmatpush3.bf16.msra.mxu0 %v546_v31 }
  0x43   :  { %551 = vmatprep.subr.bf16.mxu0 %v550_v34 }
  0x44   :  { %574 = vmatpush3.bf16.msra.mxu1 %v573_v47 }
  0x45   :  { %575 = vmatprep.subr.bf16.mxu1 %v690_v0 }
  0x46   :  { %553 = vmatpush3.bf16.msra.mxu0 %v550_v34  ;;  %v89_v34 = vld [vmem:[#allocation5 + $0x178] sm:$0xff] }
  0x47   :  { %578 = vmatprep.subr.bf16.mxu0 %v690_v0 }
  0x48   :  { %577 = vmatpush3.bf16.msra.mxu1 %v576_v50 }
  0x49   :  { %450 = vmatmul.mubr.f32.vlgmr.msra.gmra.mrb[0].mxu0 %v41_v35  ;;  %v600_v35 = vpack.c.bf16 %v89_v34, %v88_v33 }
  0x4a   :  { %519 = vmatprep.mubr.msk.f32.mxu0 %vm691_vm0, %v692_v51  ;;  %580 = vmatpush3.bf16.msra.mxu0 %v579_v55 }
  0x4b   :  { %581 = vmatprep.subr.bf16.mxu0 %v690_v0 }
  0x4e   :  { %583 = vmatpush3.bf16.msra.mxu0 %v582_v57 }
  0x4f   :  { %584 = vmatprep.subr.bf16.mxu0 %v690_v0 }
  0x52   :  { %586 = vmatpush3.bf16.msra.mxu0 %v585_v60 }
  0x53   :  { %587 = vmatprep.subr.bf16.mxu0 %v690_v0 }
  0x56   :  { %589 = vmatpush3.bf16.msra.mxu0 %v588_v63 }
  0x57   :  { %590 = vmatprep.subr.bf16.mxu0 %v690_v0 }
  0x5a   :  { %592 = vmatpush3.bf16.msra.mxu0 %v591_v3 }
  0x5b   :  { %593 = vmatprep.subr.bf16.mxu0 %v690_v0 }
  0x5e   :  { %595 = vmatpush3.bf16.msra.mxu0 %v594_v6 }
  0x5f   :  { %596 = vmatprep.subr.bf16.mxu0 %v690_v0 }
  0x62   :  { %598 = vmatpush3.bf16.msra.mxu0 %v597_v9 }
  0x63   :  { %599 = vmatprep.subr.bf16.mxu0 %v690_v0 }
  0x66   :  { %601 = vmatpush3.bf16.msra.mxu0 %v600_v35 }
 0x11c   :  { %v451_v15 = vpop.f32.mrb[0].mxu0 }
 0x11d   :  { %v167_v16 = vadd.f32 %v451_v15, %v94_v14  ;;  %v161_v17 = vpop.f32.mrb[1].mxu0 }
 0x11e   :  { %v162_v18 = vadd.f32 %v161_v17, %v94_v14 }
 0x11f   :  { %v171_v19 = vmax.f32 %v167_v16, 0.0 }
 0x120   :  { %v170_v20 = vmax.f32 %v162_v18, 0.0 }
 0x121   :  { %v178_v21 = vrot.slane %v171_v19, 4 }
 0x122   :  { %v172_v22 = vrot.slane %v170_v20, 4 }
 0x123   :  { %v179_v23 = vmax.f32 %v171_v19, %v178_v21 }
 0x124   :  { %v173_v24 = vmax.f32 %v170_v20, %v172_v22 }
 0x125   :  { %v180_v25 = vrot.slane %v179_v23, 2 }
 0x126   :  { %v174_v26 = vrot.slane %v173_v24, 2 }
 0x127   :  { %v181_v27 = vmax.f32 %v179_v23, %v180_v25 }
 0x128   :  { %v175_v28 = vmax.f32 %v173_v24, %v174_v26 }
 0x129   :  { %v182_v0 = vrot.slane %v181_v27, 1 }
 0x12a   :  { %v176_v29 = vrot.slane %v175_v28, 1 }
 0x12b   :  { %v183_v30 = vmax.f32 %v181_v27, %v182_v0 }
 0x12c   :  { %v177_v31 = vmax.f32 %v175_v28, %v176_v29 }
 0x12e   :  { %v187_v32 = vsel %vm186_vm1, %v183_v30, %v177_v31 }
 0x12f   :  { %485 = vmatmul.mubr.msk.f32.vlgmr.msra.gmra.mrb[0].mxu1 %vm189_vm2, %v187_v32 }
 0x202   :  { %v261_v38 = vpop.f32.mrb[0].mxu1 }
 0x203   :  { %v262_v39 = vadd.f32 %v261_v38, %v194_v37  ;;  %v486_v40 = vpop.f32.mrb[1].mxu1 }
 0x205   :  { %v265_v41 = vmax.f32 %v262_v39, 0.0 }
 0x207   :  { %520 = vmatmul.mubr.f32.vlgmr.msra.gmra.mrb[2].mxu0 %v265_v41 }
 0x2da   :  { %v336_v44 = vpop.f32.mrb[2].mxu0 }
 0x2db   :  { %v337_v45 = vadd.f32 %v336_v44, %v269_v43  ;;  %v521_v46 = vpop.f32.mrb[3].mxu0 }
 0x2dd   :  { %v364_v47 = vmul.f32 -1.442695, %v337_v45 }
 0x2df   :  { %610 = vpow2.f32 %v364_v47 }
 0x2e9   :  { %v611_v48 = vpop.eup %610 }
 0x2ea   :  { %v343_v49 = vadd.f32 1.0, %v611_v48 }
 0x2ec   :  { %612 = vrcp.f32 %v343_v49 }
 0x2f6   :  { %v613_v50 = vpop.eup %612 }
 0x2f7   :  { %346 = vst [vmem:[#allocation7] sm:$0xff] %v613_v50 }
 0x2f8   :  { %669 = shalt.err (!%p666_p6)
}
 0x2f9   :  { %s670_s10 = scalar_lea.hbm %s763_s2, 128 }
 0x2fa   :  { %p671_p7 = scmp.ne.s32.totalorder %s763_s2, %s670_s10  ;;  %p674_p8 = scmp.lt.u32.totalorder %s670_s10, %s763_s2 }
 0x2fc   :  { %p676_p9 = pnand %p674_p8, %p671_p7 }
 0x2fe   :  { %679 = shalt.err (!%p676_p9)
}
 0x2ff   :  { %356 = dma.vmem_to_hbm [thread:$0]  %s354_s6, 128, %s763_s2, [#allocation4]  }
 0x300   :  { %684 = dma.done.wait [#allocation4], 128  }
 0x301   :  { %685 = vsyncadd [#allocation4], 4294967168 }
 0x302   :  { %360 = vsyncpa [#allocation3], 1 }
 0x303   :  { %361 = vsyncpa [#allocation6], 1 }
 0x304   :  { %362 = vsyncpa [#allocation4], 1 }

</bundles_post_ra>
